<compile_context>
chip_gen: v5e
topology: v5e:2x2
jax: 0.10.0
libtpu: 0.0.40
codegen_flags: <defaults>
</compile_context>

<pallas_src>
import functools
import math

import jax
import jax.numpy as jnp
from jax import lax
from jax.experimental import pallas as pl
from jax.experimental.pallas import tpu as pltpu

# Module hyper-parameters (the reference module uses d_model=512, dropout=0.05).
D_MODEL = 512           # must be even (sin/cos interleave), multiple of 128 here
MAX_LEN = 64            # reference default is 5000; 64 keeps the demo light
DROPOUT_P = 0.05


def make_positional_encoding(max_len: int, d_model: int) -> jnp.ndarray:
    """Deterministic pe buffer, identical math to the PyTorch __init__."""
    position = jnp.arange(max_len, dtype=jnp.float32)[:, None]            # (L, 1)
    div_term = jnp.exp(
        jnp.arange(0, d_model, 2, dtype=jnp.float32)
        * (-(math.log(10000.0) / d_model))
    )                                                                     # (D/2,)
    angles = position * div_term                                          # (L, D/2)
    pe = jnp.zeros((max_len, 1, d_model), dtype=jnp.float32)
    pe = pe.at[:, 0, 0::2].set(jnp.sin(angles))
    pe = pe.at[:, 0, 1::2].set(jnp.cos(angles))
    return pe


# ----------------------------- in-kernel hashing -----------------------------

def _srl(x, k: int):
    """Logical right shift for int32: arithmetic shift, then clear sign-copies."""
    mask = jnp.int32((1 << (32 - k)) - 1)
    return jnp.bitwise_and(jnp.right_shift(x, k), mask)


def _hash32(x):
    """Wang hash on int32 (wraparound arithmetic == uint32 semantics)."""
    x = jnp.bitwise_xor(jnp.bitwise_xor(x, jnp.int32(61)), _srl(x, 16))
    x = x * jnp.int32(9)
    x = jnp.bitwise_xor(x, _srl(x, 4))
    x = x * jnp.int32(0x27D4EB2D)
    x = jnp.bitwise_xor(x, _srl(x, 15))
    return x


# --------------------------------- kernel ------------------------------------

def _pe_dropout_kernel(seed_ref, x_ref, pe_ref, o_ref, *, seq_len, dropout_p):
    # x_ref: (1, TS, D) VMEM tile (batch b, seq block s), pe_ref: (TS, D) VMEM,
    # seed_ref: (1,) int32 in SMEM.
    x = x_ref[...]                       # (1, TS, D)
    pe = pe_ref[...]                     # (TS, D)
    y = x + pe[None, :, :]               # broadcast pe over the (unit) batch dim

    if dropout_p > 0.0:
        _, ts, d = x_ref.shape
        b = pl.program_id(0)
        s0 = pl.program_id(1) * ts

        # Global element index -> grid/tiling-invariant dropout mask.
        row = lax.broadcasted_iota(jnp.int32, (1, ts, d), 1) + s0
        col = lax.broadcasted_iota(jnp.int32, (1, ts, d), 2)
        idx = (b * jnp.int32(seq_len) + row) * jnp.int32(d) + col

        seed_h = _hash32(seed_ref[0] + jnp.int32(0x5BD1E995))
        h = _hash32(jnp.bitwise_xor(idx, seed_h))

        # Uniform in [0, 1) from the low 23 bits (avoids unsigned<->float paths).
        u01 = (jnp.bitwise_and(h, jnp.int32((1 << 23) - 1)).astype(jnp.float32)
               * jnp.float32(1.0 / float(1 << 23)))

        # Fused select-on-scale: keep w.p. (1 - p), scale kept by 1/(1-p).
        inv_keep = jnp.float32(1.0 / (1.0 - dropout_p))
        scale = jnp.where(u01 >= jnp.float32(dropout_p), inv_keep, jnp.float32(0.0))
        y = y * scale

    o_ref[...] = y.astype(o_ref.dtype)


# -------------------------------- wrapper -------------------------------------

def _pick_tile_rows(seq_len: int, d_model: int,
                    dtype_bytes: int = 4,
                    target_bytes: int = 2 * 1024 * 1024) -> int:
    """Largest multiple-of-8 divisor of seq_len whose (ts, D) tile <= ~2 MiB
    (sized for v7x's 64 MiB VMEM with double-buffered in+out blocks)."""
    if seq_len % 8 != 0:
        return seq_len                   # full axis is always a legal block dim
    max_rows = max(8, target_bytes // (d_model * dtype_bytes))
    best = 8
    ts = 8
    while ts <= min(seq_len, max_rows):
        if seq_len % ts == 0:
            best = ts
        ts += 8
    return best


def positional_encoding_forward(x: jnp.ndarray,
                                pe_buffer: jnp.ndarray,
                                seed: int,
                                dropout_p: float = DROPOUT_P,
                                training: bool = True) -> jnp.ndarray:
    """x: (S, B, D) float32.  Returns dropout(x + pe[:S]) with shape (S, B, D)."""
    S, B, D = x.shape

    # Layout plumbing (outside the kernel): put seq in the sublane position and
    # d_model (multiple of 128) in the lane position -> dense vregs / unmasked vst.
    x_bsd = jnp.transpose(x, (1, 0, 2))          # (B, S, D)
    pe_sd = pe_buffer[:S, 0, :]                  # (S, D)
    seed_arr = jnp.array([seed], dtype=jnp.int32)

    ts = _pick_tile_rows(S, D)
    grid = (B, pl.cdiv(S, ts))

    kernel = functools.partial(
        _pe_dropout_kernel,
        seq_len=S,
        dropout_p=float(dropout_p) if training else 0.0,
    )

    out_bsd = pl.pallas_call(
        kernel,
        out_shape=jax.ShapeDtypeStruct((B, S, D), x.dtype),
        grid=grid,
        in_specs=[
            pl.BlockSpec(memory_space=pltpu.MemorySpace.SMEM),       # seed scalar
            pl.BlockSpec((1, ts, D), lambda b, s: (b, s, 0)),        # x tile
            pl.BlockSpec((ts, D), lambda b, s: (s, 0)),              # pe tile (shared across batch)
        ],
        out_specs=pl.BlockSpec((1, ts, D), lambda b, s: (b, s, 0)),
        compiler_params=pltpu.CompilerParams(
            dimension_semantics=("parallel", "parallel"),
            vmem_limit_bytes=64 * 1024 * 1024,
        ),
    )(seed_arr, x_bsd, pe_sd)

    return jnp.transpose(out_bsd, (1, 0, 2))     # back to (S, B, D)


if __name__ == "__main__":
    key = jax.random.PRNGKey(0)
    S, B, D = 8, 2, D_MODEL                      # seq=8, batch=2, d_model=512
    x = jax.random.normal(key, (S, B, D), dtype=jnp.float32)

    pe_buffer = make_positional_encoding(MAX_LEN, D_MODEL)

    out = positional_encoding_forward(x, pe_buffer, seed=1234,
                                      dropout_p=DROPOUT_P, training=True)
    out = jax.block_until_ready(out)

    # Sanity check: every output element is either 0 (dropped) or the
    # positional-encoded value scaled by 1/(1-p).
    ref = x + pe_buffer[:S]                      # (S, B, D) via broadcast
    scaled = ref / (1.0 - DROPOUT_P)
    ok = jnp.all(
        jnp.isclose(out, scaled, atol=1e-5, rtol=1e-5) | (out == 0.0)
    )
    assert out.shape == (S, B, D)
    assert bool(ok), "output elements must be dropped-to-zero or scaled x+pe"

    # Dropout actually dropped a plausible fraction (p = 0.05).
    n_total = out.size
    n_dropped = int(jnp.sum(out == 0.0))
    assert 0 < n_dropped < n_total * 0.2, f"implausible drop count {n_dropped}/{n_total}"

    # Eval-mode path (no dropout) matches the plain broadcast add exactly.
    out_eval = positional_encoding_forward(x, pe_buffer, seed=1234,
                                           dropout_p=DROPOUT_P, training=False)
    out_eval = jax.block_until_ready(out_eval)
    assert bool(jnp.allclose(out_eval, ref, atol=1e-6, rtol=1e-6))

    print("KERNEL_OK")
</pallas_src>

<mosaic_0001>
module attributes {stable_mosaic.version = 11 : i64} {
  func.func @_pe_dropout_kernel(%arg0: i32, %arg1: i32, %arg2: memref<1xi32, #tpu.memory_space<smem>>, %arg3: memref<1x8x512xf32, #tpu.memory_space<vmem>>, %arg4: memref<8x512xf32, #tpu.memory_space<vmem>>, %arg5: memref<1x8x512xf32, #tpu.memory_space<vmem>>) attributes {dimension_semantics = [#tpu.dimension_semantics<parallel>, #tpu.dimension_semantics<parallel>], iteration_bounds = array<i64: 2, 1>, scalar_prefetch = 0 : i64, scratch_operands = 0 : i64, tpu.core_type = #tpu.core_type<tc>, window_params = [{transform_indices = @transform_0, window_bounds = array<i64: 1>}, {transform_indices = @transform_1, window_bounds = array<i64: 1, 8, 512>}, {transform_indices = @transform_2, window_bounds = array<i64: 8, 512>}, {transform_indices = @transform_3, window_bounds = array<i64: 1, 8, 512>}]} {
    %c0 = arith.constant 0 : index
    %c0_0 = arith.constant 0 : index
    %c0_1 = arith.constant 0 : index
    %0 = vector.load %arg3[%c0, %c0_0, %c0_1] : memref<1x8x512xf32, #tpu.memory_space<vmem>>, vector<1x8x512xf32>
    %c0_2 = arith.constant 0 : index
    %c0_3 = arith.constant 0 : index
    %1 = vector.load %arg4[%c0_2, %c0_3] : memref<8x512xf32, #tpu.memory_space<vmem>>, vector<8x512xf32>
    %2 = vector.shape_cast %1 : vector<8x512xf32> to vector<1x8x512xf32>
    %3 = arith.addf %0, %2 : vector<1x8x512xf32>
    %c8_i32 = arith.constant 8 : i32
    %4 = arith.muli %arg1, %c8_i32 : i32
    %5 = tpu.iota {dimensions = array<i32: 1>} : vector<1x8x512xi32>
    %6 = vector.broadcast %4 : i32 to vector<1x8x512xi32>
    %7 = arith.addi %5, %6 : vector<1x8x512xi32>
    %8 = tpu.iota {dimensions = array<i32: 2>} : vector<1x8x512xi32>
    %c8_i32_4 = arith.constant 8 : i32
    %9 = arith.muli %arg0, %c8_i32_4 : i32
    %10 = vector.broadcast %9 : i32 to vector<1x8x512xi32>
    %11 = arith.addi %10, %7 : vector<1x8x512xi32>
    %c512_i32 = arith.constant 512 : i32
    %12 = vector.broadcast %c512_i32 : i32 to vector<1x8x512xi32>
    %13 = arith.muli %11, %12 : vector<1x8x512xi32>
    %14 = arith.addi %13, %8 : vector<1x8x512xi32>
    %c0_5 = arith.constant 0 : index
    %15 = memref.load %arg2[%c0_5] : memref<1xi32, #tpu.memory_space<smem>>
    %c1540483477_i32 = arith.constant 1540483477 : i32
    %16 = arith.addi %15, %c1540483477_i32 : i32
    %c61_i32 = arith.constant 61 : i32
    %17 = arith.xori %16, %c61_i32 : i32
    %c16_i32 = arith.constant 16 : i32
    %18 = arith.shrsi %16, %c16_i32 : i32
    %c65535_i32 = arith.constant 65535 : i32
    %19 = arith.andi %18, %c65535_i32 : i32
    %20 = arith.xori %17, %19 : i32
    %c9_i32 = arith.constant 9 : i32
    %21 = arith.muli %20, %c9_i32 : i32
    %c4_i32 = arith.constant 4 : i32
    %22 = arith.shrsi %21, %c4_i32 : i32
    %c268435455_i32 = arith.constant 268435455 : i32
    %23 = arith.andi %22, %c268435455_i32 : i32
    %24 = arith.xori %21, %23 : i32
    %c668265261_i32 = arith.constant 668265261 : i32
    %25 = arith.muli %24, %c668265261_i32 : i32
    %c15_i32 = arith.constant 15 : i32
    %26 = arith.shrsi %25, %c15_i32 : i32
    %c131071_i32 = arith.constant 131071 : i32
    %27 = arith.andi %26, %c131071_i32 : i32
    %28 = arith.xori %25, %27 : i32
    %29 = vector.broadcast %28 : i32 to vector<1x8x512xi32>
    %30 = arith.xori %14, %29 : vector<1x8x512xi32>
    %c61_i32_6 = arith.constant 61 : i32
    %31 = vector.broadcast %c61_i32_6 : i32 to vector<1x8x512xi32>
    %32 = arith.xori %30, %31 : vector<1x8x512xi32>
    %c16_i32_7 = arith.constant 16 : i32
    %33 = vector.broadcast %c16_i32_7 : i32 to vector<1x8x512xi32>
    %34 = arith.shrsi %30, %33 : vector<1x8x512xi32>
    %c65535_i32_8 = arith.constant 65535 : i32
    %35 = vector.broadcast %c65535_i32_8 : i32 to vector<1x8x512xi32>
    %36 = arith.andi %34, %35 : vector<1x8x512xi32>
    %37 = arith.xori %32, %36 : vector<1x8x512xi32>
    %c9_i32_9 = arith.constant 9 : i32
    %38 = vector.broadcast %c9_i32_9 : i32 to vector<1x8x512xi32>
    %39 = arith.muli %37, %38 : vector<1x8x512xi32>
    %c4_i32_10 = arith.constant 4 : i32
    %40 = vector.broadcast %c4_i32_10 : i32 to vector<1x8x512xi32>
    %41 = arith.shrsi %39, %40 : vector<1x8x512xi32>
    %c268435455_i32_11 = arith.constant 268435455 : i32
    %42 = vector.broadcast %c268435455_i32_11 : i32 to vector<1x8x512xi32>
    %43 = arith.andi %41, %42 : vector<1x8x512xi32>
    %44 = arith.xori %39, %43 : vector<1x8x512xi32>
    %c668265261_i32_12 = arith.constant 668265261 : i32
    %45 = vector.broadcast %c668265261_i32_12 : i32 to vector<1x8x512xi32>
    %46 = arith.muli %44, %45 : vector<1x8x512xi32>
    %c15_i32_13 = arith.constant 15 : i32
    %47 = vector.broadcast %c15_i32_13 : i32 to vector<1x8x512xi32>
    %48 = arith.shrsi %46, %47 : vector<1x8x512xi32>
    %c131071_i32_14 = arith.constant 131071 : i32
    %49 = vector.broadcast %c131071_i32_14 : i32 to vector<1x8x512xi32>
    %50 = arith.andi %48, %49 : vector<1x8x512xi32>
    %51 = arith.xori %46, %50 : vector<1x8x512xi32>
    %c8388607_i32 = arith.constant 8388607 : i32
    %52 = vector.broadcast %c8388607_i32 : i32 to vector<1x8x512xi32>
    %53 = arith.andi %51, %52 : vector<1x8x512xi32>
    %54 = arith.sitofp %53 : vector<1x8x512xi32> to vector<1x8x512xf32>
    %cst = arith.constant 1.1920929E-7 : f32
    %55 = vector.broadcast %cst : f32 to vector<1x8x512xf32>
    %56 = arith.mulf %54, %55 : vector<1x8x512xf32>
    %cst_15 = arith.constant 5.000000e-02 : f32
    %57 = vector.broadcast %cst_15 : f32 to vector<1x8x512xf32>
    %58 = arith.cmpf oge, %56, %57 : vector<1x8x512xf32>
    %cst_16 = arith.constant 1.05263162 : f32
    %cst_17 = arith.constant 0.000000e+00 : f32
    %59 = vector.broadcast %cst_16 : f32 to vector<1x8x512xf32>
    %60 = vector.broadcast %cst_17 : f32 to vector<1x8x512xf32>
    %61 = arith.select %58, %59, %60 : vector<1x8x512xi1>, vector<1x8x512xf32>
    %62 = arith.mulf %3, %61 : vector<1x8x512xf32>
    %c0_18 = arith.constant 0 : index
    %c0_19 = arith.constant 0 : index
    %c0_20 = arith.constant 0 : index
    %63 = vector.load %arg5[%c0_18, %c0_19, %c0_20] : memref<1x8x512xf32, #tpu.memory_space<vmem>>, vector<1x8x512xf32>
    tpu.vector_store %arg5[%c0_18, %c0_19, %c0_20], %62 {strides = array<i32>} : memref<1x8x512xf32, #tpu.memory_space<vmem>>, vector<1x8x512xf32>,
    return
  }
  func.func @transform_0(%arg0: i32, %arg1: i32) -> i32 {
    %c0_i32 = arith.constant 0 : i32
    %c0_i32_0 = arith.constant 0 : i32
    return %c0_i32 : i32
  }
  func.func @transform_1(%arg0: i32, %arg1: i32) -> (i32, i32, i32) {
    %c0_i32 = arith.constant 0 : i32
    %c0_i32_0 = arith.constant 0 : i32
    return %arg0, %arg1, %c0_i32 : i32, i32, i32
  }
  func.func @transform_2(%arg0: i32, %arg1: i32) -> (i32, i32) {
    %c0_i32 = arith.constant 0 : i32
    %c0_i32_0 = arith.constant 0 : i32
    return %arg1, %c0_i32 : i32, i32
  }
  func.func @transform_3(%arg0: i32, %arg1: i32) -> (i32, i32, i32) {
    %c0_i32 = arith.constant 0 : i32
    %c0_i32_0 = arith.constant 0 : i32
    return %arg0, %arg1, %c0_i32 : i32, i32, i32
  }
}

</mosaic_0001>

<bundles_post_ra>
// kernel: tpu_custom_call.1
= control target key start
LH: loop header
LB: loop body
LE: loop exit
PB: predicated region body
PF: predicated region fallthrough
CT: control target
= control target key end

     0   :  { %s910_s0 = inlined_call_operand.<no memory space> [shape: s32[1], index: 0, kind: input, shape index: {}]   ;;  %s911_s1 = inlined_call_operand.hbm [shape: f32[2,8,512], index: 1, kind: input, shape index: {}]   ;;  %s912_s2 = inlined_call_operand.hbm [shape: f32[8,512], index: 2, kind: input, shape index: {}]   ;;  %s913_s3 = inlined_call_operand.hbm [shape: f32[2,8,512], index: 3, kind: output, shape index: {}]  }
   0x1   :  { %8 = sst [smem:[#allocation2]] %s910_s0 }
   0x2   :  { %9 = vsyncpa [#allocation4], 0 }
   0x3   :  { %11 = vsyncpa [#allocation4 + $0x1], 0 }
   0x4   :  { %12 = vsyncpa [#allocation7], 0 }
   0x5   :  { %13 = vsyncpa [#allocation5], 0 }
   0x6   :  { %15 = vsyncpa [#allocation5 + $0x1], 0  ;;  %s750_s14 = smov 0   ;;  %s752_s15 = smov 0  }
   0x7   :  { %s754_s16 = smov 0   ;;  %s756_s17 = smov 0  }
   0x8   :  { %s758_s18 = smov 0   ;;  %s760_s19 = smov 0  }
   0x9 LB: > { %s471_s0 = sadd.s32 4294967295, %s723_s19   ;;  %s472_s20 = sadd.s32 4294967294, %s723_s19   ;;  %s723_s19 = sphi %s760_s19, %s21_s19   ;;  %s719_s18 = sphi %s758_s18, %s925_s18   ;;  %s715_s17 = sphi %s756_s17, %s924_s17   ;;  %s711_s16 = sphi %s754_s16, %s923_s16   ;;  %s707_s15 = sphi %s752_s15, %s922_s15   ;;  %s703_s14 = sphi %s750_s14, %s921_s14  }
   0xa   : > { %p76_p0 = scmp.ne.s32.totalorder %s707_s15, %s703_s14  ;;  %p784_p1 = scmp.eq.s32.totalorder %s471_s0, 0 }
   0xb   : > { %p788_p2 = scmp.eq.s32.totalorder %s471_s0, 1  ;;  %p134_p3 = scmp.eq.s32.totalorder %s472_s20, 1 }
   0xc   : > { %p794_p4 = por %p784_p1, %p76_p0  ;;  %p473_p5 = scmp.ge.s32.totalorder %s723_s19, 1 }
   0xd   : > { %p799_p6 = por %p134_p3, %p76_p0  ;;  %p141_p7 = scmp.lt.s32.totalorder %s723_s19, 3 }
   0xe   : > { %s159_s27 = sshll.u32 %s912_s2, 4  ;;  %p475_p9 = scmp.ge.s32.totalorder %s723_s19, 2  ;;  %s160_s27 = int_to_ptr.hbm [resolvable:$true] %s159_s27 }
   0xf   : > { %p807_p8 = pnand %p473_p5, %p141_p7  ;;  %s725_s29 = smov [#allocation6]  }
  0x10   : > { %s161_s30 = sshll.u32 %s725_s29, 4  ;;  %s33_s4 = sadd.s32 1, %s719_s18  ;;  %s162_s30 = int_to_ptr.vmem [resolvable:$true] %s161_s30 }
  0x11   : > { %p511_p10 = pneg %p807_p8  ;;  %p35_p12 = scmp.ge.s32.totalorder %s33_s4, 2 }
  0x12   : > { %s63_s5 = sadd.s32 1, %s711_s16  ;;  %p70_p13 = scmp.ne.s32.totalorder %s711_s16, %s707_s15 }
  0x13   : > { %p512_p11 = pnand %p511_p10, %p784_p1  ;;  %p71_p0 = scmp.eq.s32.totalorder %s723_s19, 0 }
  0x14   : > { %s927_s4 = smov (%p35_p12, %s33_s4), 0  ;;  %p829_p5 = por %p788_p2, %p70_p13 }
  0x15   : > { %514 = dma.hbm_to_vmem [thread:$0]  (!%p512_p11), %s160_s27, 512, %s162_s30, [#allocation7]  }
  0x16   : > { %p823_p3 = por %p71_p0, %p70_p13  ;;  %s58_s8 = ssub.s32 %s719_s18, %s927_s4 }
  0x17   : > { %p524_p7 = scmp.lt.s32.totalorder %s723_s19, 2  ;;  %p61_p10 = scmp.eq.s32.totalorder %s58_s8, 0 }
  0x18   : > { %s172_s9 = sand.u32 1, %s711_s16   ;;  %s501_s12 = sshll.u32 %s719_s18, 5 }
  0x19   : > { %s476_s10 = sshll.u32 %s172_s9, 5  ;;  %s183_s20 = scalar_lea.hbm %s911_s1, %s501_s12 }
  0x1a   : > { %s838_s11 = scalar_select %p61_p10, %s711_s16, %s63_s5  }
  0x1b   : > { %s176_s25 = scalar_lea.vmem [#allocation3], %s476_s10  ;;  %s185_s22 = sshll.u32 %s183_s20, 4  ;;  %s186_s22 = int_to_ptr.hbm [resolvable:$true] %s185_s22 }
  0x1c   : > { %s187_s26 = sshll.u32 %s176_s25, 4  ;;  %p516_p2 = pnand %p524_p7, %p823_p3  ;;  %s188_s26 = int_to_ptr.vmem [resolvable:$true] %s187_s26 }
  0x1d   : > { %s173_s27 = scalar_lea.sflag [#allocation4], %s172_s9  ;;  %196 = sbr.rel (%p807_p8) target bundleno = 92 (0x5c), region = 32 }
  0x1e   : > { %518 = dma.hbm_to_vmem [thread:$0]  (!%p516_p2), %s186_s22, 512, %s188_s26, %s173_s27  }
  0x1f   : > { %s849_s29 = sand.u32 (!%p807_p8), 1, %s707_s15  }
  0x20   : > { %s480_s30 = sshll.u32 (!%p807_p8), %s849_s29, 5  ;;  %s199_s5 = scalar_lea.sflag (!%p807_p8), [#allocation4], %s849_s29 }
  0x21   : > { %s855_s8 = scalar_lea.vmem (!%p807_p8), [#allocation3], %s480_s30 }
  0x22   : > { %690 = dma.done.wait (%p794_p4), %s199_s5, 512  }
  0x23   : > { %692 = vsyncadd (%p794_p4), %s199_s5, 4294966784 }
  0x24   : > { %694 = dma.done.wait (%p784_p1), [#allocation7], 512  }
  0x25   : > { %696 = vsyncadd (%p784_p1), [#allocation7], 4294966784  ;;  %s261_s28 = sld [smem:[#allocation2]]  ;;  %v244_v0 = vlaneseq  ;;  %s483_s6 = sshll.u32 %s715_s17, 3  ;;  %v231_v54 = vld [vmem:[%s855_s8] sm:$0xff]  ;;  %v232_v58 = vld [vmem:[%s855_s8 + $0x8] sm:$0xff] }
  0x26   : > { %v254_v2 = vstv %s483_s6  ;;  %v235_v55 = vld [vmem:[#allocation6] sm:$0xff]  ;;  %v236_v59 = vld [vmem:[#allocation6 + $0x8] sm:$0xff] }
  0x27   : > { %v245_v1 = vshrl.u32 %v244_v0, 7  ;;  %v249_v3 = vand.u32 127, %v244_v0  ;;  %v233_v0 = vld [vmem:[%s855_s8 + $0x10] sm:$0xff] }
  0x29   : > { %v255_v4 = vadd.s32 %v254_v2, %v245_v1  ;;  %v250_v6 = vadd.s32 128, %v249_v3  ;;  %v251_v7 = vadd.s32 256, %v249_v3  ;;  %v252_v8 = vadd.s32 384, %v249_v3  ;;  %v237_v1 = vld [vmem:[#allocation6 + $0x10] sm:$0xff] }
  0x2a   : > { %v239_v2 = vadd.f32 %v235_v55, %v231_v54 }
  0x2b   : > { %s262_s9 = sadd.s32 1540483477, %s261_s28  ;;  %v256_v5 = vmul.u32 512, %v255_v4  ;;  %s502_s28 = sshll.u32 %s715_s17, 5  ;;  %v234_v4 = vld [vmem:[%s855_s8 + $0x18] sm:$0xff] }
  0x2c   : > { %s263_s10 = sxor.u32 61, %s262_s9  ;;  %s264_s12 = sshra.s32 %s262_s9, 16 }
  0x2d   : > { %s265_s13 = sand.u32 65535, %s264_s12  ;;  %v257_v9 = vadd.s32 %v256_v5, %v249_v3  ;;  %v258_v10 = vadd.s32 %v256_v5, %v250_v6  ;;  %v259_v11 = vadd.s32 %v256_v5, %v251_v7  ;;  %v260_v12 = vadd.s32 %v256_v5, %v252_v8  ;;  %v238_v5 = vld [vmem:[#allocation6 + $0x18] sm:$0xff]  ;;  %s230_s12 = scalar_lea.vmem [#allocation8], %s480_s30 }
  0x2e   : > { %s266_s23 = sxor.u32 %s265_s13, %s263_s10  ;;  %v240_v8 = vadd.f32 %v236_v59, %v232_v58  ;;  %s370_s10 = scalar_lea.hbm %s913_s3, %s502_s28 }
  0x2f   : > { %s267_s0 = smul.u32 9, %s266_s23  ;;  %s372_s13 = sshll.u32 %s230_s12, 4  ;;  %s373_s13 = int_to_ptr.vmem [resolvable:$true] %s372_s13 }
  0x30   : > { %s374_s17 = sshll.u32 %s370_s10, 4  ;;  %s357_s30 = scalar_lea.sflag [#allocation5], %s849_s29  ;;  %s375_s17 = int_to_ptr.hbm [resolvable:$true] %s374_s17 }
  0x31   : > { %s268_s20 = sshra.s32 %s267_s0, 4  ;;  %s651_s8 = sshra.s32 %s375_s17, 4  ;;  %s652_s8 = int_to_ptr.hbm [resolvable:$true] %s651_s8 }
  0x32   : > { %s269_s25 = sand.u32 268435455, %s268_s20  ;;  %s653_s23 = scalar_lea.hbm %s652_s8, 32 }
  0x33   : > { %s270_s21 = sxor.u32 %s269_s25, %s267_s0  ;;  %p654_p1 = scmp.ne.s32.totalorder %s652_s8, %s653_s23 }
  0x34   : > { %s271_s26 = smul.u32 668265261, %s270_s21  ;;  %s657_s25 = scalar_lea.hbm %s913_s3, 64 }
  0x35   : > { %p655_p4 = pnand %p654_p1, %p829_p5  ;;  %p658_p11 = scmp.lt.s32.totalorder %s652_s8, %s913_s3 }
  0x36   : > { %s272_s22 = sshra.s32 %s271_s26, 15  ;;  %p659_p12 = scmp.lt.s32.totalorder %s657_s25, %s653_s23 }
  0x37   : > { %s273_s27 = sand.u32 131071, %s272_s22  ;;  %p656_p8 = pneg %p655_p4 }
  0x38   : > { %s274_s5 = sxor.u32 %s273_s27, %s271_s26  ;;  %p660_p13 = por %p659_p12, %p658_p11 }
  0x39   : > { %v275_v13 = vstv %s274_s5 }
  0x3a   : > { %v276_v14 = vxor.u32 %v275_v13, %v257_v9  ;;  %v277_v15 = vxor.u32 %v275_v13, %v258_v10  ;;  %v278_v16 = vxor.u32 %v275_v13, %v259_v11  ;;  %v279_v17 = vxor.u32 %v275_v13, %v260_v12  ;;  %p661_p0 = pnand %p660_p13, %p656_p8 }
  0x3b   : > { %v241_v10 = vadd.f32 %v237_v1, %v233_v0  ;;  %v242_v13 = vadd.f32 %v238_v5, %v234_v4 }
  0x3c   : > { %v280_v18 = vxor.u32 61, %v276_v14  ;;  %v484_v19 = vshrl.u32 %v276_v14, 16  ;;  %v281_v20 = vxor.u32 61, %v277_v15  ;;  %v485_v21 = vshrl.u32 %v277_v15, 16 }
  0x3d   : > { %v282_v22 = vxor.u32 61, %v278_v16  ;;  %v486_v23 = vshrl.u32 %v278_v16, 16  ;;  %v283_v24 = vxor.u32 61, %v279_v17  ;;  %v487_v25 = vshrl.u32 %v279_v17, 16 }
  0x3e   : > { %v292_v26 = vxor.u32 %v484_v19, %v280_v18  ;;  %v293_v27 = vxor.u32 %v485_v21, %v281_v20  ;;  %v726_v14 = vmov 0.0  }
  0x3f   : > { %v294_v28 = vxor.u32 %v486_v23, %v282_v22  ;;  %v295_v29 = vxor.u32 %v487_v25, %v283_v24 }
  0x40   : > { %v296_v30 = vmul.u32 9, %v292_v26  ;;  %v297_v31 = vmul.u32 9, %v293_v27 }
  0x41   : > { %v298_v32 = vmul.u32 9, %v294_v28  ;;  %v299_v33 = vmul.u32 9, %v295_v29 }
  0x42   : > { %v488_v34 = vshrl.u32 %v296_v30, 4  ;;  %v489_v35 = vshrl.u32 %v297_v31, 4 }
  0x43   : > { %v490_v36 = vshrl.u32 %v298_v32, 4  ;;  %v491_v37 = vshrl.u32 %v299_v33, 4 }
  0x44   : > { %v308_v38 = vxor.u32 %v488_v34, %v296_v30  ;;  %v309_v39 = vxor.u32 %v489_v35, %v297_v31 }
  0x45   : > { %v310_v40 = vxor.u32 %v490_v36, %v298_v32  ;;  %v311_v41 = vxor.u32 %v491_v37, %v299_v33 }
  0x46   : > { %v312_v42 = vmul.u32 668265261, %v308_v38  ;;  %v313_v43 = vmul.u32 668265261, %v309_v39 }
  0x47   : > { %v314_v44 = vmul.u32 668265261, %v310_v40  ;;  %v315_v45 = vmul.u32 668265261, %v311_v41 }
  0x48   : > { %v492_v46 = vshrl.u32 %v312_v42, 15  ;;  %v493_v47 = vshrl.u32 %v313_v43, 15 }
  0x49   : > { %v494_v48 = vshrl.u32 %v314_v44, 15  ;;  %v495_v49 = vshrl.u32 %v315_v45, 15 }
  0x4a   : > { %v324_v50 = vxor.u32 %v492_v46, %v312_v42  ;;  %v325_v51 = vxor.u32 %v493_v47, %v313_v43 }
  0x4b   : > { %v326_v52 = vxor.u32 %v494_v48, %v314_v44  ;;  %v327_v53 = vxor.u32 %v495_v49, %v315_v45 }
  0x4c   : > { %v328_v56 = vand.u32 8388607, %v324_v50  ;;  %v329_v57 = vand.u32 8388607, %v325_v51 }
  0x4d   : > { %v330_v60 = vand.u32 8388607, %v326_v52  ;;  %v331_v61 = vand.u32 8388607, %v327_v53 }
  0x4e   : > { %v332_v62 = vcvt.s32.f32 %v328_v56  ;;  %v333_v63 = vcvt.s32.f32 %v329_v57 }
  0x4f   : > { %v334_v3 = vcvt.s32.f32 %v330_v60  ;;  %v335_v6 = vcvt.s32.f32 %v331_v61 }
  0x50   : > { %v336_v7 = vmul.f32 1.1920929e-07, %v332_v62  ;;  %v337_v9 = vmul.f32 1.1920929e-07, %v333_v63 }
  0x51   : > { %v338_v11 = vmul.f32 1.1920929e-07, %v334_v3  ;;  %v339_v12 = vmul.f32 1.1920929e-07, %v335_v6 }
  0x52   : > { %vm340_vm0 = vcmp.ge.f32.partialorder %v336_v7, 0.05  ;;  %vm341_vm1 = vcmp.ge.f32.partialorder %v337_v9, 0.05 }
  0x53   : > { %v344_v15 = vsel %vm340_vm0, 1.0526316, %v726_v14  ;;  %v345_v16 = vsel %vm341_vm1, 1.0526316, %v726_v14  ;;  %vm342_vm2 = vcmp.ge.f32.partialorder %v338_v11, 0.05 }
  0x54   : > { %v348_v17 = vmul.f32 %v344_v15, %v239_v2  ;;  %v349_v18 = vmul.f32 %v345_v16, %v240_v8  ;;  %v346_v19 = vsel %vm342_vm2, 1.0526316, %v726_v14  ;;  %vm343_vm3 = vcmp.ge.f32.partialorder %v339_v12, 0.05 }
  0x55   : > { %v350_v20 = vmul.f32 %v346_v19, %v241_v10  ;;  %v347_v21 = vsel %vm343_vm3, 1.0526316, %v726_v14 }
  0x56   : > { %352 = vst [vmem:[%s230_s12] sm:$0xff] %v348_v17  ;;  %v351_v22 = vmul.f32 %v347_v21, %v242_v13 }
  0x57   : > { %353 = vst [vmem:[%s230_s12 + $0x8] sm:$0xff] %v349_v18 }
  0x58   : > { %354 = vst [vmem:[%s230_s12 + $0x10] sm:$0xff] %v350_v20 }
  0x59   : > { %355 = vst [vmem:[%s230_s12 + $0x18] sm:$0xff] %v351_v22 }
  0x5a   : > { %664 = shalt.err (!%p661_p0)
}
  0x5b   : > { %509 = dma.vmem_to_hbm [thread:$0]  (%p829_p5), %s373_s13, 512, %s375_s17, %s357_s30  }
  0x5c PF: > { %s386_s29 = sand.u32 1, %s703_s14   ;;  %p520_p3 = pnand %p475_p9, %p799_p6 }
  0x5d   : > { %s387_s22 = scalar_lea.sflag [#allocation5], %s386_s29 }
  0x5e   : > { %p521_p7 = pneg %p520_p3 }
  0x60   : > { %698 = dma.done.wait (%p521_p7), %s387_s22, 512  }
  0x61   : > { %700 = vsyncadd (%p521_p7), %s387_s22, 4294966784  ;;  %s21_s19 = sadd.s32 1, %s723_s19   ;;  %s921_s14 = smov %s707_s15 }
  0x62   : > { %p18_p10 = scmp.ge.s32.totalorder %s21_s19, 4   ;;  %s922_s15 = smov %s711_s16 }
  0x63   : > { %s923_s16 = smov %s838_s11  ;;  %s924_s17 = smov %s719_s18 }
  0x64   : > { %s925_s18 = smov %s927_s4  ;;  %20 = sbr.rel (!%p18_p10) target bundleno = 9 (0x9), region = 82 }
  0x69   :  { %393 = vsyncpa [#allocation4], 1 }
  0x6a   :  { %395 = vsyncpa [#allocation4 + $0x1], 1 }
  0x6b   :  { %396 = vsyncpa [#allocation7], 1 }
  0x6c   :  { %397 = vsyncpa [#allocation5], 1 }
  0x6d   :  { %399 = vsyncpa [#allocation5 + $0x1], 1 }

</bundles_post_ra>
